<compile_context>
chip_gen: v7x
topology: tpu7x:2x2x1
jax: 0.10.0
libtpu: 0.0.40
codegen_flags: <defaults>
</compile_context>

<pallas_src>
import functools

import jax
import jax.numpy as jnp
from jax import lax
from jax.experimental import pallas as pl
from jax.experimental.pallas import tpu as pltpu

LN_EPS = 1e-5  # nn.LayerNorm default


def _round_up(x, m):
    return ((x + m - 1) // m) * m


def _patch_embed_ln_kernel(p_ref, w_ref, prm_ref, o_ref, *, inv_e):
    # p_ref:   (tm, Kp)  bf16 patch rows (flattened c, ph, pw; zero-padded K)
    # w_ref:   (Kp, Ep)  bf16 projection weight (zero-padded K rows / E columns)
    # prm_ref: (8, Ep)   f32 packed params: rows [bias, gamma, beta, 0...]
    # o_ref:   (tm, Ep)
    bias = prm_ref[0:1, :]
    gamma = prm_ref[1:2, :]
    beta = prm_ref[2:3, :]

    # MXU: bf16 operands, f32 accumulation.
    x = jnp.dot(p_ref[...], w_ref[...], preferred_element_type=jnp.float32)
    x = x + bias

    # One-sweep LayerNorm statistics over the *true* embed dim.  Padded embed
    # columns of x are exactly zero (zero weight columns + zero bias), so they
    # contribute nothing to either reduction; divide by the real E via inv_e.
    mean = jnp.sum(x, axis=-1, keepdims=True) * inv_e
    ex2 = jnp.sum(x * x, axis=-1, keepdims=True) * inv_e
    var = jnp.maximum(ex2 - mean * mean, 0.0)
    xn = (x - mean) * lax.rsqrt(var + LN_EPS)
    # Padded columns have gamma == beta == 0, so the (sliced-off) tail stays finite.
    o_ref[...] = (xn * gamma + beta).astype(o_ref.dtype)


def _vmem_working_set_bytes(tm, k_pad, e_pad, out_itemsize):
    # double-buffered bf16 LHS tile + bf16 weight + f32 params + output tile,
    # plus ~4 live (tm, Ep) f32 LayerNorm intermediates.
    return (2 * tm * k_pad * 2
            + 2 * k_pad * e_pad * 2
            + 2 * 8 * e_pad * 4
            + 2 * tm * e_pad * out_itemsize
            + 4 * tm * e_pad * 4)


@functools.partial(jax.jit, static_argnames=("patch_size", "tm", "out_dtype"))
def vit_patch_embed(pixel_values, conv_w, conv_b, ln_g, ln_b, *,
                    patch_size, tm=512, out_dtype=None):
    """pixel_values: (B, C, H, W); conv_w: (E, C, P, P); conv_b/ln_g/ln_b: (E,)."""
    B, C, H, W = pixel_values.shape
    E = conv_w.shape[0]
    P = patch_size
    nh, nw = H // P, W // P
    num_patches = nh * nw
    M = B * num_patches
    K = C * P * P
    out_dtype = pixel_values.dtype if out_dtype is None else jnp.dtype(out_dtype)
    out_itemsize = jnp.dtype(out_dtype).itemsize

    # --- row tiling / lane-dense padding --------------------------------------
    tm = max(8, min(tm, _round_up(M, 8)))          # don't over-pad tiny problems
    if M > 8:
        # keep >= 2 grid steps so ("parallel",) can shard rows across both v7x TCs
        tm = min(tm, _round_up(pl.cdiv(M, 2), 8))
    k_pad = _round_up(K, 128)
    e_pad = _round_up(E, 128)
    while tm > 8 and _vmem_working_set_bytes(tm, k_pad, e_pad, out_itemsize) > (48 << 20):
        tm = max(8, _round_up(tm // 2, 8))
    m_pad = _round_up(M, tm)

    # --- im2col glue: cast-first, pad fused into the same traced copy ---------
    x = pixel_values.astype(jnp.bfloat16)               # narrow BEFORE moving bytes
    x = x.reshape(B, C, nh, P, nw, P)
    x = jnp.transpose(x, (0, 2, 4, 1, 3, 5))            # (B, nh, nw, C, P, P)
    patches = x.reshape(M, K)
    if (m_pad, k_pad) != (M, K):
        patches = jnp.pad(patches, ((0, m_pad - M), (0, k_pad - K)))

    # conv weight (E, C, P, P) -> (K, E) so that patches @ w == conv output.
    w = conv_w.reshape(E, K).T.astype(jnp.bfloat16)
    if (k_pad, e_pad) != (K, E):
        w = jnp.pad(w, ((0, k_pad - K), (0, e_pad - E)))

    # Packed per-column params (one small DMA): rows [bias, gamma, beta]; 8 sublanes.
    params = jnp.zeros((8, e_pad), jnp.float32)
    params = params.at[0, :E].set(conv_b.astype(jnp.float32))
    params = params.at[1, :E].set(ln_g.astype(jnp.float32))
    params = params.at[2, :E].set(ln_b.astype(jnp.float32))

    grid = (m_pad // tm,)

    vmem_limit = int(min(max(
        _vmem_working_set_bytes(tm, k_pad, e_pad, out_itemsize) + (16 << 20),
        32 << 20), 64 << 20))

    cost = pl.CostEstimate(
        flops=2 * m_pad * k_pad * e_pad,
        transcendentals=m_pad,
        bytes_accessed=(patches.size * 2 + w.size * 2 + params.size * 4
                        + m_pad * e_pad * out_itemsize),
    )

    kernel = functools.partial(_patch_embed_ln_kernel, inv_e=1.0 / E)

    out = pl.pallas_call(
        kernel,
        out_shape=jax.ShapeDtypeStruct((m_pad, e_pad), out_dtype),
        grid_spec=pltpu.PrefetchScalarGridSpec(
            num_scalar_prefetch=0,
            grid=grid,
            in_specs=[
                pl.BlockSpec((tm, k_pad), lambda i: (i, 0)),
                pl.BlockSpec((k_pad, e_pad), lambda i: (0, 0)),
                pl.BlockSpec((8, e_pad), lambda i: (0, 0)),
            ],
            out_specs=pl.BlockSpec((tm, e_pad), lambda i: (i, 0)),
        ),
        compiler_params=pltpu.CompilerParams(
            dimension_semantics=("parallel",),
            vmem_limit_bytes=vmem_limit,
        ),
        cost_estimate=cost,
    )(patches, w, params)

    if m_pad != M:
        out = out[:M]
    if e_pad != E:
        # Column slice of a padded output is an extra copy; skipped for standard
        # ViT embed dims (multiples of 128) where e_pad == E.
        out = out[:, :E]
    return out.reshape(B, num_patches, E)


def _reference(pixel_values, conv_w, conv_b, ln_g, ln_b, patch_size):
    # Pure-JAX f32 reference: strided conv (+ bias, as in nn.Conv2d), flatten, LayerNorm.
    P = patch_size
    y = lax.conv_general_dilated(
        pixel_values, conv_w, window_strides=(P, P), padding="VALID",
        dimension_numbers=("NCHW", "OIHW", "NCHW"),
        precision=lax.Precision.HIGHEST)
    y = y + conv_b[None, :, None, None]
    B, E, nh, nw = y.shape
    y = y.reshape(B, E, nh * nw).transpose(0, 2, 1)      # (B, num_patches, E)
    mean = jnp.mean(y, axis=-1, keepdims=True)
    var = jnp.mean((y - mean) ** 2, axis=-1, keepdims=True)
    return (y - mean) * lax.rsqrt(var + LN_EPS) * ln_g + ln_b


if __name__ == "__main__":
    # Small config: image 16x16, patch 4, channels 4, embed_dim 32 -> 16 patches/img.
    B, C, H, W = 2, 4, 16, 16
    P, E = 4, 32

    key = jax.random.PRNGKey(0)
    k1, k2, k3, k4, k5 = jax.random.split(key, 5)
    pixel_values = jax.random.normal(k1, (B, C, H, W), dtype=jnp.float32)
    conv_w = jax.random.normal(k2, (E, C, P, P), dtype=jnp.float32) * 0.02
    conv_b = jax.random.normal(k3, (E,), dtype=jnp.float32) * 0.02
    ln_g = 1.0 + 0.1 * jax.random.normal(k4, (E,), dtype=jnp.float32)
    ln_b = 0.1 * jax.random.normal(k5, (E,), dtype=jnp.float32)

    out = vit_patch_embed(pixel_values, conv_w, conv_b, ln_g, ln_b, patch_size=P)
    out = jax.block_until_ready(out)

    ref = _reference(pixel_values, conv_w, conv_b, ln_g, ln_b, P)
    assert out.shape == (B, (H // P) * (W // P), E)
    # bf16 MXU operands (f32 accumulation) vs. an f32 reference -> loosened tolerance.
    max_err = float(jnp.max(jnp.abs(out - ref)))
    assert jnp.allclose(out, ref, atol=5e-2, rtol=5e-2), max_err
    print("KERNEL_OK")
</pallas_src>

<mosaic_0001>
module attributes {stable_mosaic.version = 11 : i64} {
  func.func @_patch_embed_ln_kernel(%arg0: i32, %arg1: memref<16x128xbf16, #tpu.memory_space<vmem>>, %arg2: memref<128x128xbf16, #tpu.memory_space<vmem>>, %arg3: memref<8x128xf32, #tpu.memory_space<vmem>>, %arg4: memref<16x128xf32, #tpu.memory_space<vmem>>) attributes {dimension_semantics = [#tpu.dimension_semantics<parallel>], iteration_bounds = array<i64: 2>, scalar_prefetch = 0 : i64, scratch_operands = 0 : i64, tpu.core_type = #tpu.core_type<tc>, window_params = [{transform_indices = @transform_0, window_bounds = array<i64: 16, 128>}, {pipeline_mode = #tpu.pipeline_mode<synchronous>, transform_indices = @transform_1, window_bounds = array<i64: 128, 128>}, {pipeline_mode = #tpu.pipeline_mode<synchronous>, transform_indices = @transform_2, window_bounds = array<i64: 8, 128>}, {transform_indices = @transform_3, window_bounds = array<i64: 16, 128>}]} {
    %c0 = arith.constant 0 : index
    %c0_0 = arith.constant 0 : index
    %0 = vector.load %arg3[%c0, %c0_0] : memref<8x128xf32, #tpu.memory_space<vmem>>, vector<1x128xf32>
    %c1 = arith.constant 1 : index
    %c0_1 = arith.constant 0 : index
    %1 = vector.load %arg3[%c1, %c0_1] : memref<8x128xf32, #tpu.memory_space<vmem>>, vector<1x128xf32>
    %c2 = arith.constant 2 : index
    %c0_2 = arith.constant 0 : index
    %2 = vector.load %arg3[%c2, %c0_2] : memref<8x128xf32, #tpu.memory_space<vmem>>, vector<1x128xf32>
    %c0_3 = arith.constant 0 : index
    %c0_4 = arith.constant 0 : index
    %3 = vector.load %arg1[%c0_3, %c0_4] : memref<16x128xbf16, #tpu.memory_space<vmem>>, vector<16x128xbf16>
    %c0_5 = arith.constant 0 : index
    %c0_6 = arith.constant 0 : index
    %4 = vector.load %arg2[%c0_5, %c0_6] : memref<128x128xbf16, #tpu.memory_space<vmem>>, vector<128x128xbf16>
    %cst = arith.constant dense<0.000000e+00> : vector<16x128xf32>
    %5 = tpu.matmul %3, %4, %cst {dimension_numbers = #tpu.dot_dimension_numbers<[1], [0], [0], [1], [0, 0, 1, 1], [], []>} : vector<16x128xbf16>, vector<128x128xbf16>, vector<16x128xf32> -> vector<16x128xf32>
    %6 = vector.broadcast %0 : vector<1x128xf32> to vector<16x128xf32>
    %7 = arith.addf %5, %6 : vector<16x128xf32>
    %cst_7 = arith.constant dense<0.000000e+00> : vector<16xf32>
    %8 = vector.multi_reduction <add>, %7, %cst_7 [1] : vector<16x128xf32> to vector<16xf32>
    %9 = vector.shape_cast %8 : vector<16xf32> to vector<16x1xf32>
    %cst_8 = arith.constant 3.125000e-02 : f32
    %10 = vector.broadcast %cst_8 : f32 to vector<16x1xf32>
    %11 = arith.mulf %9, %10 : vector<16x1xf32>
    %12 = arith.mulf %7, %7 : vector<16x128xf32>
    %cst_9 = arith.constant dense<0.000000e+00> : vector<16xf32>
    %13 = vector.multi_reduction <add>, %12, %cst_9 [1] : vector<16x128xf32> to vector<16xf32>
    %14 = vector.shape_cast %13 : vector<16xf32> to vector<16x1xf32>
    %cst_10 = arith.constant 3.125000e-02 : f32
    %15 = vector.broadcast %cst_10 : f32 to vector<16x1xf32>
    %16 = arith.mulf %14, %15 : vector<16x1xf32>
    %17 = arith.mulf %11, %11 : vector<16x1xf32>
    %18 = arith.subf %16, %17 : vector<16x1xf32>
    %cst_11 = arith.constant 0.000000e+00 : f32
    %19 = vector.broadcast %cst_11 : f32 to vector<16x1xf32>
    %20 = arith.maximumf %18, %19 : vector<16x1xf32>
    %21 = vector.broadcast %11 : vector<16x1xf32> to vector<16x128xf32>
    %22 = arith.subf %7, %21 : vector<16x128xf32>
    %cst_12 = arith.constant 9.99999974E-6 : f32
    %23 = vector.broadcast %cst_12 : f32 to vector<16x1xf32>
    %24 = arith.addf %20, %23 : vector<16x1xf32>
    %25 = math.rsqrt %24 : vector<16x1xf32>
    %26 = vector.broadcast %25 : vector<16x1xf32> to vector<16x128xf32>
    %27 = arith.mulf %22, %26 : vector<16x128xf32>
    %28 = vector.broadcast %1 : vector<1x128xf32> to vector<16x128xf32>
    %29 = arith.mulf %27, %28 : vector<16x128xf32>
    %30 = vector.broadcast %2 : vector<1x128xf32> to vector<16x128xf32>
    %31 = arith.addf %29, %30 : vector<16x128xf32>
    %c0_13 = arith.constant 0 : index
    %c0_14 = arith.constant 0 : index
    %32 = vector.load %arg4[%c0_13, %c0_14] : memref<16x128xf32, #tpu.memory_space<vmem>>, vector<16x128xf32>
    tpu.vector_store %arg4[%c0_13, %c0_14], %31 {strides = array<i32>} : memref<16x128xf32, #tpu.memory_space<vmem>>, vector<16x128xf32>,
    return
  }
  func.func @transform_0(%arg0: i32) -> (i32, i32) {
    %c0_i32 = arith.constant 0 : i32
    %c0_i32_0 = arith.constant 0 : i32
    return %arg0, %c0_i32 : i32, i32
  }
  func.func @transform_1(%arg0: i32) -> (i32, i32) {
    %c0_i32 = arith.constant 0 : i32
    %c0_i32_0 = arith.constant 0 : i32
    %c0_i32_1 = arith.constant 0 : i32
    return %c0_i32, %c0_i32_0 : i32, i32
  }
  func.func @transform_2(%arg0: i32) -> (i32, i32) {
    %c0_i32 = arith.constant 0 : i32
    %c0_i32_0 = arith.constant 0 : i32
    %c0_i32_1 = arith.constant 0 : i32
    return %c0_i32, %c0_i32_0 : i32, i32
  }
  func.func @transform_3(%arg0: i32) -> (i32, i32) {
    %c0_i32 = arith.constant 0 : i32
    %c0_i32_0 = arith.constant 0 : i32
    return %arg0, %c0_i32 : i32, i32
  }
}

</mosaic_0001>

<bundles_post_ra>
// kernel: vit_patch_embed.1
= control target key start
LH: loop header
LB: loop body
LE: loop exit
PB: predicated region body
PF: predicated region fallthrough
CT: control target
= control target key end

     0   :  { %8 = vsyncpa [#allocation3], 0  ;;  %s745_s0 = inlined_call_operand.vmem [shape: bf16[32,128], index: 0, kind: input, shape index: {}]   ;;  %s746_s1 = inlined_call_operand.vmem [shape: bf16[128,128], index: 1, kind: input, shape index: {}]   ;;  %s747_s2 = inlined_call_operand.vmem [shape: f32[8,128], index: 2, kind: input, shape index: {}]   ;;  %s748_s3 = inlined_call_operand.hbm [shape: f32[32,128], index: 3, kind: output, shape index: {}]  }
   0x1   :  { %10 = vsyncpa [#allocation3 + $0x1], 0  ;;  %s610_s12 = smov 0   ;;  %s612_s13 = smov 0  }
   0x2   :  { %s614_s14 = smov 0   ;;  %s616_s15 = smov 0  }
   0x3 LB: > { %s631_s16 = sadd.s32 4294967295, %s583_s15   ;;  %s411_s17 = sadd.s32 4294967294, %s583_s15   ;;  %s583_s15 = sphi %s616_s15, %s754_s15   ;;  %s579_s14 = sphi %s614_s14, %s753_s14   ;;  %s575_s13 = sphi %s612_s13, %s752_s13   ;;  %s571_s12 = sphi %s610_s12, %s751_s12  }
   0x4   : > { %s635_s18 = sadd.s32 1, %s583_s15   ;;  %s91_s19 = sadd.s32 1, %s579_s14 }
   0x5   : > { %s88_s20 = ssub.s32 %s583_s15, %s635_s18  ;;  %p101_p0 = scmp.ne.s32.totalorder %s579_s14, %s575_s13 }
   0x6   : > { %p89_p1 = scmp.eq.s32.totalorder %s88_s20, 0  ;;  %p102_p2 = scmp.eq.s32.totalorder %s631_s16, 1 }
   0x7   : > { %p107_p3 = scmp.ne.s32.totalorder %s575_s13, %s571_s12  ;;  %p108_p4 = scmp.eq.s32.totalorder %s411_s17, 1 }
   0x8   : > { %s646_s21 = scalar_select %p89_p1, %s579_s14, %s91_s19  }
   0x9   : > { %p648_p5 = por %p102_p2, %p101_p0  ;;  %p652_p6 = por %p108_p4, %p107_p3 }
   0xa   : > { %p414_p7 = scmp.ge.s32.totalorder %s583_s15, 1  ;;  %p141_p8 = scmp.lt.s32.totalorder %s583_s15, 3 }
   0xc   : > { %p142_p9 = pnand %p414_p7, %p141_p8 }
   0xd   : > { %v508_v0 = vld [vmem:[%s746_s1] sm:$0xff] (!%p142_p9)   ;;  %v585_v1 = vmov (!%p142_p9), 0.0   ;;  %v509_v2 = vld [vmem:[%s746_s1 + $0x8] sm:$0xff] (!%p142_p9)   ;;  %vm586_vm0 = vmmov (!%p142_p9), 0   ;;  %s416_s28 = sshll.u32 (!%p142_p9), %s631_s16, 1  ;;  %v510_v3 = vld [vmem:[%s746_s1 + $0x10] sm:$0xff] (!%p142_p9)  }
   0xe   : > { %145 = sbr.rel (%p142_p9) target bundleno = 448 (0x1c0), region = 32  ;;  %445 = vmatprep.subr.bf16.mxu0 (!%p142_p9), %v585_v1  ;;  %461 = vmatprep.mubr.msk.bf16.mxu0 (!%p142_p9), %vm586_vm0, %v585_v1  ;;  %p166_p10 = scmp.lt.s32.totalorder (!%p142_p9), %s416_s28, 3  ;;  %v511_v4 = vld [vmem:[%s746_s1 + $0x18] sm:$0xff] (!%p142_p9)   ;;  %v512_v5 = vld [vmem:[%s746_s1 + $0x20] sm:$0xff] (!%p142_p9)   ;;  %v513_v6 = vld [vmem:[%s746_s1 + $0x28] sm:$0xff] (!%p142_p9)  }
   0xf   : > { %446 = vmatpush3.bf16.msra.mxu0 (!%p142_p9), %v508_v0  ;;  %v514_v7 = vld [vmem:[%s746_s1 + $0x30] sm:$0xff] (!%p142_p9)   ;;  %v515_v8 = vld [vmem:[%s746_s1 + $0x38] sm:$0xff] (!%p142_p9)   ;;  %v418_v10 = vld [vmem:[%s747_s2] ss:$0 sm:$0xff] (!%p142_p9)  ;;  %s162_s29 = sand.u32 (!%p142_p9), 1, %s575_s13   ;;  %s435_s8 = sshll.u32 (!%p142_p9), %s631_s16, 8 }
  0x10   : > { %447 = vmatprep.subr.bf16.mxu0 (!%p142_p9), %v585_v1  ;;  %v428_v37 = vld [vmem:[%s747_s2 + $0x1] ss:$0 sm:$0xff] (!%p142_p9)  ;;  %s415_s5 = sshll.u32 (!%p142_p9), %s162_s29, 4  ;;  %v429_v39 = vld [vmem:[%s747_s2 + $0x2] ss:$0 sm:$0xff] (!%p142_p9)  ;;  %s700_s19 = scalar_lea.hbm (!%p142_p9), %s748_s3, %s435_s8 }
  0x11   : > { %s164_s9 = scalar_lea.vmem (!%p142_p9), [#allocation2], %s415_s5  ;;  %s704_s20 = scalar_lea.sflag (!%p142_p9), [#allocation3], %s162_s29 }
  0x12   : > { %s349_s10 = sshll.u32 (!%p142_p9), %s164_s9, 4  ;;  %s587_s16 = smov (!%p142_p9), [#allocation2]   ;;  %s702_s10 = int_to_ptr.vmem [resolvable:$true] %s349_s10 }
  0x13   : > { %448 = vmatpush3.bf16.msra.mxu0 (!%p142_p9), %v509_v2  ;;  %s521_s24 = scalar_lea.vmem (!%p142_p9), %s702_s10, 256  ;;  %s525_s25 = sshll.u32 (!%p142_p9), %s587_s16, 4  ;;  %s526_s25 = int_to_ptr.vmem [resolvable:$false] %s525_s25 }
  0x14   : > { %449 = vmatprep.subr.bf16.mxu0 (!%p142_p9), %v585_v1  ;;  %p522_p11 = scmp.ne.s32.totalorder (!%p142_p9), %s702_s10, %s521_s24  ;;  %s527_s26 = scalar_lea.vmem (!%p142_p9), %s526_s25, 512 }
  0x15   : > { %s756_s28 = smov (!%p166_p10, %s416_s28), 3  ;;  %p528_p0 = scmp.lt.s32.totalorder %s702_s10, %s526_s25 }
  0x16   : > { %s417_s4 = sshll.u32 %s756_s28, 2  ;;  %p523_p12 = pnand %p522_p11, %p648_p5 }
  0x17   : > { %s169_s7 = scalar_lea.vmem %s745_s0, %s417_s4  ;;  %450 = vmatpush3.bf16.msra.mxu0 %v510_v3  ;;  %p529_p1 = scmp.lt.s32.totalorder %s527_s26, %s521_s24 }
  0x18   : > { %451 = vmatprep.subr.bf16.mxu0 %v585_v1  ;;  %v516_v9 = vld [vmem:[%s169_s7] sm:$0xff]   ;;  %p524_p13 = pneg %p523_p12 }
  0x19   : > { %p530_p2 = por %p529_p1, %p528_p0 }
  0x1b   : > { %452 = vmatpush3.bf16.msra.mxu0 %v511_v4  ;;  %p531_p3 = pnand %p530_p2, %p524_p13 }
  0x1c   : > { %453 = vmatprep.subr.bf16.mxu0 %v585_v1 }
  0x1f   : > { %454 = vmatpush3.bf16.msra.mxu0 %v512_v5 }
  0x20   : > { %455 = vmatprep.subr.bf16.mxu0 %v585_v1 }
  0x23   : > { %456 = vmatpush3.bf16.msra.mxu0 %v513_v6 }
  0x24   : > { %457 = vmatprep.subr.bf16.mxu0 %v585_v1 }
  0x27   : > { %458 = vmatpush3.bf16.msra.mxu0 %v514_v7 }
  0x28   : > { %459 = vmatprep.subr.bf16.mxu0 %v585_v1 }
  0x2b   : > { %460 = vmatpush3.bf16.msra.mxu0 %v515_v8 }
  0x2e   : > { %462 = vmatmul.mubr.bf16.vlgmr.msra.gmra.mrb[0].mxu0 %v516_v9 }
 0x101   : > { %v286_v11 = vpop.f32.mrb[0].mxu0 }
 0x102   : > { %v287_v12 = vadd.f32 %v418_v10, %v286_v11  ;;  %v463_v13 = vpop.f32.mrb[1].mxu0 }
 0x103   : > { %v289_v14 = vpop.f32.mrb[2].mxu0 }
 0x104   : > { %v290_v15 = vadd.f32 %v418_v10, %v289_v14  ;;  %293 = vadd.xlane.f32.xlu0 %v287_v12  ;;  %v464_v16 = vpop.f32.mrb[3].mxu0  ;;  %v299_v17 = vmul.f32 %v287_v12, %v287_v12 }
 0x106   : > { %301 = vadd.xlane.f32.xlu1 %v299_v17  ;;  %v300_v18 = vmul.f32 %v290_v15, %v290_v15 }
 0x108   : > { %295 = vadd.xlane.f32.xlu0 %v290_v15 }
 0x10a   : > { %303 = vadd.xlane.f32.xlu1 %v300_v18 }
 0x191   : > { %v294_v19 = vpop.xlane.xlu0 %293 }
 0x192   : > { %v297_v20 = vmul.f32 0.03125, %v294_v19 }
 0x193   : > { %v302_v21 = vpop.xlane.xlu1 %301 }
 0x194   : > { %v307_v22 = vmul.f32 %v297_v20, %v297_v20  ;;  %v305_v23 = vmul.f32 0.03125, %v302_v21  ;;  %v313_v35 = vsub.f32 %v287_v12, %v297_v20 }
 0x195   : > { %v296_v24 = vpop.xlane.xlu0 %295 }
 0x196   : > { %v309_v25 = vsub.f32 %v305_v23, %v307_v22  ;;  %v298_v26 = vmul.f32 0.03125, %v296_v24 }
 0x197   : > { %v304_v27 = vpop.xlane.xlu1 %303 }
 0x198   : > { %v311_v28 = vmax.f32 %v309_v25, 0.0  ;;  %v308_v29 = vmul.f32 %v298_v26, %v298_v26  ;;  %v306_v30 = vmul.f32 0.03125, %v304_v27  ;;  %v314_v40 = vsub.f32 %v290_v15, %v298_v26 }
 0x19a   : > { %v315_v31 = vadd.f32 1e-05, %v311_v28  ;;  %v310_v32 = vsub.f32 %v306_v30, %v308_v29 }
 0x19c   : > { %517 = vrsqrt.f32 %v315_v31  ;;  %v312_v33 = vmax.f32 %v310_v32, 0.0 }
 0x19e   : > { %v316_v34 = vadd.f32 1e-05, %v312_v33 }
 0x1a0   : > { %519 = vrsqrt.f32 %v316_v34 }
 0x1a6   : > { %v518_v36 = vpop.eup %517 }
 0x1a7   : > { %v319_v38 = vmul.f32 %v518_v36, %v313_v35 }
 0x1a9   : > { %v325_v41 = vmul.f32 %v428_v37, %v319_v38 }
 0x1aa   : > { %v520_v42 = vpop.eup %519 }
 0x1ab   : > { %v320_v43 = vmul.f32 %v520_v42, %v314_v40  ;;  %v331_v44 = vadd.f32 %v429_v39, %v325_v41 }
 0x1ad   : > { %v326_v45 = vmul.f32 %v428_v37, %v320_v43  ;;  %333 = vst [vmem:[%s164_s9] sm:$0xff] %v331_v44 }
 0x1af   : > { %v332_v46 = vadd.f32 %v429_v39, %v326_v45 }
 0x1b1   : > { %334 = vst [vmem:[%s164_s9 + $0x8] sm:$0xff] %v332_v46 }
 0x1b2   : > { %534 = shalt.err (!%p531_p3)
}
 0x1b3   : > { %s535_s27 = scalar_lea.hbm %s700_s19, 256  ;;  %s539_s30 = scalar_lea.hbm %s748_s3, 512 }
 0x1b4   : > { %p536_p4 = scmp.ne.s32.totalorder %s700_s19, %s535_s27  ;;  %p540_p9 = scmp.lt.u32.totalorder %s700_s19, %s748_s3 }
 0x1b5   : > { %p541_p10 = scmp.lt.u32.totalorder %s539_s30, %s535_s27  ;;  %p543_p12 = scmp.lt.u32.totalorder %s535_s27, %s700_s19 }
 0x1b6   : > { %p537_p7 = pnand %p536_p4, %p648_p5 }
 0x1b7   : > { %p542_p11 = por %p541_p10, %p540_p9 }
 0x1b8   : > { %p538_p8 = pneg %p537_p7 }
 0x1b9   : > { %p544_p13 = por %p543_p12, %p542_p11 }
 0x1bb   : > { %p545_p0 = pnand %p544_p13, %p538_p8 }
 0x1bd   : > { %548 = shalt.err (!%p545_p0)
}
 0x1be   : > { %s588_s6 = smov 128   ;;  %s589_s7 = smov 8  }
 0x1bf   : > { %465 = dma.vmem_to_hbm [thread:$0]  (%p648_p5), %s702_s10, 256, %s700_s19, %s704_s20, %s588_s6, %s588_s6, %s589_s7  }
 0x1c0 PF: > { %p471_p1 = scmp.ge.s32.totalorder %s583_s15, 2  ;;  %s364_s8 = sand.u32 1, %s571_s12  }
 0x1c1   : > { %s365_s9 = scalar_lea.sflag [#allocation3], %s364_s8 }
 0x1c2   : > { %p468_p2 = pnand %p471_p1, %p652_p6 }
 0x1c4   : > { %566 = dma.done.wait (!%p468_p2), %s365_s9, 256  }
 0x1c5   : > { %568 = vsyncadd (!%p468_p2), %s365_s9, 4294967040  ;;  %p13_p3 = scmp.ge.s32.totalorder %s635_s18, 4   ;;  %s751_s12 = smov %s575_s13 }
 0x1c6   : > { %s752_s13 = smov %s579_s14  ;;  %s753_s14 = smov %s646_s21 }
 0x1c7   : > { %s754_s15 = smov %s635_s18  ;;  %15 = sbr.rel (!%p13_p3) target bundleno = 3 (0x3), region = 67 }
 0x1ce   :  { %370 = vsyncpa [#allocation3], 1 }
 0x1cf   :  { %372 = vsyncpa [#allocation3 + $0x1], 1 }

</bundles_post_ra>
